<compile_context>
chip_gen: v7x
topology: tpu7x:2x2x1
jax: 0.10.0
libtpu: 0.0.40
codegen_flags: <defaults>
</compile_context>

<pallas_src>
import numpy as np
import jax
import jax.numpy as jnp
from jax.experimental import pallas as pl
from jax.experimental.pallas import tpu as pltpu

D_IN = 784      # d in the PyTorch module
C_CODE = 2      # c in the PyTorch module
CODE_PAD = 128  # lane-dense padding for the encode-only output


def _pick_tb(batch):
    """Batch tile.

    <=1024 rows: one tile covering the whole (sublane-rounded) batch — no ragged
    remainder, no wasted compute.  >1024 rows: 1024-row tiles (cap per v7x VMEM
    guidance); the last partial block is masked by Pallas, so no pad/slice HBM
    traffic either way.
    """
    rounded = max(8, ((batch + 7) // 8) * 8)
    return rounded if rounded <= 1024 else 1024


# ----------------------------- kernels ---------------------------------------


def _decode_kernel(x_ref, w_enc_ref, b_enc_ref, w_dec_ref, b_dec_ref, out_ref):
    # Encoder: (TB, 784) @ (784, 2) on the MXU with bf16 operands / f32 accumulate.
    # The code stays in vregs; it never hits HBM.
    x = x_ref[...].astype(jnp.bfloat16)
    w = w_enc_ref[...].astype(jnp.bfloat16)
    code = jnp.dot(x, w, preferred_element_type=jnp.float32) + b_enc_ref[...]
    # Decoder with K=2 as two VPU broadcast-FMAs (f32) — skip the MXU for a
    # 2-deep contraction.
    out = (code[:, 0:1] * w_dec_ref[0:1, :]
           + code[:, 1:2] * w_dec_ref[1:2, :]
           + b_dec_ref[...])
    out_ref[...] = out.astype(out_ref.dtype)


def _encode_kernel(x_ref, w_enc_ref, b_enc_ref, code_ref):
    # Encoder only.  Weight/bias/output are lane-padded to 128 so the store is a
    # full unmasked vst and the writeback DMA is contiguous.
    x = x_ref[...].astype(jnp.bfloat16)
    w = w_enc_ref[...].astype(jnp.bfloat16)
    code = jnp.dot(x, w, preferred_element_type=jnp.float32) + b_enc_ref[...]
    code_ref[...] = code.astype(code_ref.dtype)


# ----------------------------- wrappers ---------------------------------------


def pad_encoder_params(params):
    """Lane-pad encoder weight/bias to 128 output columns (zeros beyond col 1).

    Call once at parameter-preparation time (init_params does this), not per
    forward call.
    """
    w_enc_p = jnp.zeros((D_IN, CODE_PAD), jnp.float32).at[:, :C_CODE].set(
        params["w_enc"])
    b_enc_p = jnp.zeros((1, CODE_PAD), jnp.float32).at[0, :C_CODE].set(
        params["b_enc"])
    return w_enc_p, b_enc_p


def autoencoder_forward(x, params, encode_only=False):
    """Pallas implementation of Autoencoder.forward.

    x: (B, 784) float32
    params: dict with w_enc (784, 2), b_enc (2,), w_dec (2, 784), b_dec (784,)
            and optionally precomputed w_enc_pad / b_enc_pad.

    encode_only=True returns the (B, 2) code.
    TODO(synk): torch returns code.detach().numpy() (host numpy); we keep the
    result on device — a sync D2H copy inside forward would dominate wall clock.
    """
    B, d = x.shape
    assert d == D_IN

    TB = _pick_tb(B)
    nb = pl.cdiv(B, TB)   # partial last block is masked by Pallas; no pad/slice

    compiler_params = pltpu.CompilerParams(
        dimension_semantics=("parallel",),
        vmem_limit_bytes=32 * 1024 * 1024,  # covers TB=1024 double-buffering on v5e too
    )

    if encode_only:
        w_enc_p = params.get("w_enc_pad")
        b_enc_p = params.get("b_enc_pad")
        if w_enc_p is None or b_enc_p is None:
            w_enc_p, b_enc_p = pad_encoder_params(params)

        code_padded = pl.pallas_call(
            _encode_kernel,
            out_shape=jax.ShapeDtypeStruct((B, CODE_PAD), jnp.float32),
            grid=(nb,),
            in_specs=[
                pl.BlockSpec((TB, D_IN), lambda i: (i, 0)),        # x tile
                pl.BlockSpec((D_IN, CODE_PAD), lambda i: (0, 0)),  # w_enc (resident)
                pl.BlockSpec((1, CODE_PAD), lambda i: (0, 0)),     # b_enc (resident)
            ],
            out_specs=pl.BlockSpec((TB, CODE_PAD), lambda i: (i, 0)),
            compiler_params=compiler_params,
        )(x, w_enc_p, b_enc_p)

        # Small (B, 2) slice back to the module's code shape.
        return code_padded[:, :C_CODE]

    w_enc = params["w_enc"]                      # (784, 2)
    b_enc = params["b_enc"].reshape(1, C_CODE)   # (1, 2)
    w_dec = params["w_dec"]                      # (2, 784)
    b_dec = params["b_dec"].reshape(1, D_IN)     # (1, 784)

    out = pl.pallas_call(
        _decode_kernel,
        out_shape=jax.ShapeDtypeStruct((B, D_IN), jnp.float32),
        grid=(nb,),
        in_specs=[
            pl.BlockSpec((TB, D_IN), lambda i: (i, 0)),       # x tile
            pl.BlockSpec((D_IN, C_CODE), lambda i: (0, 0)),   # w_enc (resident)
            pl.BlockSpec((1, C_CODE), lambda i: (0, 0)),      # b_enc (resident)
            pl.BlockSpec((C_CODE, D_IN), lambda i: (0, 0)),   # w_dec (resident)
            pl.BlockSpec((1, D_IN), lambda i: (0, 0)),        # b_dec (resident)
        ],
        out_specs=pl.BlockSpec((TB, D_IN), lambda i: (i, 0)),
        compiler_params=compiler_params,
    )(x, w_enc, b_enc, w_dec, b_dec)

    return out


def init_params(key):
    """Deterministic init mimicking torch.nn.Linear's U(-1/sqrt(fan_in), 1/sqrt(fan_in)).

    Also precomputes the lane-padded encoder weight/bias used by the
    encode-only kernel (hoisted out of the per-call wrapper).
    """
    k1, k2, k3, k4 = jax.random.split(key, 4)
    bound_enc = 1.0 / np.sqrt(D_IN)
    bound_dec = 1.0 / np.sqrt(C_CODE)
    params = {
        # stored as (in_features, out_features) so kernels compute x @ W
        "w_enc": jax.random.uniform(k1, (D_IN, C_CODE), jnp.float32,
                                    -bound_enc, bound_enc),
        "b_enc": jax.random.uniform(k2, (C_CODE,), jnp.float32,
                                    -bound_enc, bound_enc),
        "w_dec": jax.random.uniform(k3, (C_CODE, D_IN), jnp.float32,
                                    -bound_dec, bound_dec),
        "b_dec": jax.random.uniform(k4, (D_IN,), jnp.float32,
                                    -bound_dec, bound_dec),
    }
    w_enc_p, b_enc_p = pad_encoder_params(params)
    params["w_enc_pad"] = w_enc_p
    params["b_enc_pad"] = b_enc_p
    return params


if __name__ == "__main__":
    key = jax.random.PRNGKey(0)
    kx, kp = jax.random.split(key)
    params = init_params(kp)

    B = 8
    x = jax.random.normal(kx, (B, D_IN), jnp.float32)

    # Full forward (decode path)
    out = jax.block_until_ready(autoencoder_forward(x, params, encode_only=False))
    assert out.shape == (B, D_IN)

    # Encode-only path
    code = jax.block_until_ready(autoencoder_forward(x, params, encode_only=True))
    assert code.shape == (B, C_CODE)

    # Reference in full f32 precision; kernel uses bf16 MXU operands with f32
    # accumulation, so tolerances are loosened accordingly.
    hi = jax.lax.Precision.HIGHEST
    code_ref = jnp.dot(x, params["w_enc"], precision=hi) + params["b_enc"]
    out_ref = jnp.dot(code_ref, params["w_dec"], precision=hi) + params["b_dec"]
    np.testing.assert_allclose(np.asarray(out), np.asarray(out_ref),
                               rtol=2e-2, atol=2e-2)
    np.testing.assert_allclose(np.asarray(code), np.asarray(code_ref),
                               rtol=2e-2, atol=2e-2)

    # Ragged batch: 700 rows -> one 704-row tile, masked writeback, no wrapper
    # pad / slice HBM passes.
    B2 = 700
    x2 = jax.random.normal(kx, (B2, D_IN), jnp.float32)
    out2 = jax.block_until_ready(autoencoder_forward(x2, params))
    assert out2.shape == (B2, D_IN)
    out2_ref = (jnp.dot(x2, params["w_enc"], precision=hi) + params["b_enc"])
    out2_ref = jnp.dot(out2_ref, params["w_dec"], precision=hi) + params["b_dec"]
    np.testing.assert_allclose(np.asarray(out2), np.asarray(out2_ref),
                               rtol=2e-2, atol=2e-2)

    print("KERNEL_OK")
</pallas_src>

<mosaic_0001>
module attributes {stable_mosaic.version = 11 : i64} {
  func.func @_decode_kernel(%arg0: i32, %arg1: memref<8x784xf32, #tpu.memory_space<vmem>>, %arg2: memref<784x2xf32, #tpu.memory_space<vmem>>, %arg3: memref<1x2xf32, #tpu.memory_space<vmem>>, %arg4: memref<2x784xf32, #tpu.memory_space<vmem>>, %arg5: memref<1x784xf32, #tpu.memory_space<vmem>>, %arg6: memref<8x784xf32, #tpu.memory_space<vmem>>) attributes {dimension_semantics = [#tpu.dimension_semantics<parallel>], iteration_bounds = array<i64: 1>, scalar_prefetch = 0 : i64, scratch_operands = 0 : i64, tpu.core_type = #tpu.core_type<tc>, window_params = [{transform_indices = @transform_0, window_bounds = array<i64: 8, 784>}, {pipeline_mode = #tpu.pipeline_mode<synchronous>, transform_indices = @transform_1, window_bounds = array<i64: 784, 2>}, {pipeline_mode = #tpu.pipeline_mode<synchronous>, transform_indices = @transform_2, window_bounds = array<i64: 1, 2>}, {pipeline_mode = #tpu.pipeline_mode<synchronous>, transform_indices = @transform_3, window_bounds = array<i64: 2, 784>}, {pipeline_mode = #tpu.pipeline_mode<synchronous>, transform_indices = @transform_4, window_bounds = array<i64: 1, 784>}, {transform_indices = @transform_5, window_bounds = array<i64: 8, 784>}]} {
    %c0 = arith.constant 0 : index
    %c0_0 = arith.constant 0 : index
    %0 = vector.load %arg1[%c0, %c0_0] : memref<8x784xf32, #tpu.memory_space<vmem>>, vector<8x784xf32>
    %1 = arith.truncf %0 : vector<8x784xf32> to vector<8x784xbf16>
    %c0_1 = arith.constant 0 : index
    %c0_2 = arith.constant 0 : index
    %2 = vector.load %arg2[%c0_1, %c0_2] : memref<784x2xf32, #tpu.memory_space<vmem>>, vector<784x2xf32>
    %3 = arith.truncf %2 : vector<784x2xf32> to vector<784x2xbf16>
    %cst = arith.constant dense<0.000000e+00> : vector<8x2xf32>
    %4 = tpu.matmul %1, %3, %cst {dimension_numbers = #tpu.dot_dimension_numbers<[1], [0], [0], [1], [0, 0, 1, 1], [], []>} : vector<8x784xbf16>, vector<784x2xbf16>, vector<8x2xf32> -> vector<8x2xf32>
    %c0_3 = arith.constant 0 : index
    %c0_4 = arith.constant 0 : index
    %5 = vector.load %arg3[%c0_3, %c0_4] : memref<1x2xf32, #tpu.memory_space<vmem>>, vector<1x2xf32>
    %6 = vector.broadcast %5 : vector<1x2xf32> to vector<8x2xf32>
    %7 = arith.addf %4, %6 : vector<8x2xf32>
    %8 = vector.extract_strided_slice %7 {offsets = [0, 0], sizes = [8, 1], strides = [1, 1]} : vector<8x2xf32> to vector<8x1xf32>
    %c0_5 = arith.constant 0 : index
    %c0_6 = arith.constant 0 : index
    %9 = vector.load %arg4[%c0_5, %c0_6] : memref<2x784xf32, #tpu.memory_space<vmem>>, vector<1x784xf32>
    %10 = vector.broadcast %8 : vector<8x1xf32> to vector<8x784xf32>
    %11 = vector.broadcast %9 : vector<1x784xf32> to vector<8x784xf32>
    %12 = arith.mulf %10, %11 : vector<8x784xf32>
    %13 = vector.extract_strided_slice %7 {offsets = [0, 1], sizes = [8, 1], strides = [1, 1]} : vector<8x2xf32> to vector<8x1xf32>
    %c1 = arith.constant 1 : index
    %c0_7 = arith.constant 0 : index
    %14 = vector.load %arg4[%c1, %c0_7] : memref<2x784xf32, #tpu.memory_space<vmem>>, vector<1x784xf32>
    %15 = vector.broadcast %13 : vector<8x1xf32> to vector<8x784xf32>
    %16 = vector.broadcast %14 : vector<1x784xf32> to vector<8x784xf32>
    %17 = arith.mulf %15, %16 : vector<8x784xf32>
    %18 = arith.addf %12, %17 : vector<8x784xf32>
    %c0_8 = arith.constant 0 : index
    %c0_9 = arith.constant 0 : index
    %19 = vector.load %arg5[%c0_8, %c0_9] : memref<1x784xf32, #tpu.memory_space<vmem>>, vector<1x784xf32>
    %20 = vector.broadcast %19 : vector<1x784xf32> to vector<8x784xf32>
    %21 = arith.addf %18, %20 : vector<8x784xf32>
    %c0_10 = arith.constant 0 : index
    %c0_11 = arith.constant 0 : index
    %22 = vector.load %arg6[%c0_10, %c0_11] : memref<8x784xf32, #tpu.memory_space<vmem>>, vector<8x784xf32>
    tpu.vector_store %arg6[%c0_10, %c0_11], %21 {strides = array<i32>} : memref<8x784xf32, #tpu.memory_space<vmem>>, vector<8x784xf32>,
    return
  }
  func.func @transform_0(%arg0: i32) -> (i32, i32) {
    %c0_i32 = arith.constant 0 : i32
    %c0_i32_0 = arith.constant 0 : i32
    return %arg0, %c0_i32 : i32, i32
  }
  func.func @transform_1(%arg0: i32) -> (i32, i32) {
    %c0_i32 = arith.constant 0 : i32
    %c0_i32_0 = arith.constant 0 : i32
    %c0_i32_1 = arith.constant 0 : i32
    return %c0_i32, %c0_i32_0 : i32, i32
  }
  func.func @transform_2(%arg0: i32) -> (i32, i32) {
    %c0_i32 = arith.constant 0 : i32
    %c0_i32_0 = arith.constant 0 : i32
    %c0_i32_1 = arith.constant 0 : i32
    return %c0_i32, %c0_i32_0 : i32, i32
  }
  func.func @transform_3(%arg0: i32) -> (i32, i32) {
    %c0_i32 = arith.constant 0 : i32
    %c0_i32_0 = arith.constant 0 : i32
    %c0_i32_1 = arith.constant 0 : i32
    return %c0_i32, %c0_i32_0 : i32, i32
  }
  func.func @transform_4(%arg0: i32) -> (i32, i32) {
    %c0_i32 = arith.constant 0 : i32
    %c0_i32_0 = arith.constant 0 : i32
    %c0_i32_1 = arith.constant 0 : i32
    return %c0_i32, %c0_i32_0 : i32, i32
  }
  func.func @transform_5(%arg0: i32) -> (i32, i32) {
    %c0_i32 = arith.constant 0 : i32
    %c0_i32_0 = arith.constant 0 : i32
    return %arg0, %c0_i32 : i32, i32
  }
}

</mosaic_0001>

<bundles_post_ra>
// kernel: tpu_custom_call.1
= control target key start
LH: loop header
LB: loop body
LE: loop exit
PB: predicated region body
PF: predicated region fallthrough
CT: control target
= control target key end

     0   :  { %s1008_s0 = inlined_call_operand.vmem [shape: f32[8,784], index: 0, kind: input, shape index: {}]   ;;  %s1009_s1 = inlined_call_operand.vmem [shape: f32[784,2], index: 1, kind: input, shape index: {}]   ;;  %s1010_s2 = inlined_call_operand.vmem [shape: f32[1,2], index: 2, kind: input, shape index: {}]   ;;  %s1011_s3 = inlined_call_operand.vmem [shape: f32[2,784], index: 3, kind: input, shape index: {}]   ;;  %s1012_s4 = inlined_call_operand.vmem [shape: f32[1,784], index: 4, kind: input, shape index: {}]   ;;  %s1013_s5 = inlined_call_operand.hbm [shape: f32[8,784], index: 5, kind: output, shape index: {}]  }
   0x1   :  { %v52_v0 = vld [vmem:[%s1009_s1 + $0x80] sm:$0xff]  ;;  %v53_v1 = vld [vmem:[%s1009_s1 + $0x88] sm:$0xff]  ;;  %v54_v11 = vld [vmem:[%s1009_s1 + $0x90] sm:$0xff] }
   0x2   :  { %v36_v2 = vld [vmem:[%s1009_s1] sm:$0xff]  ;;  %v142_v3 = vpack.c.bf16 %v53_v1, %v52_v0  ;;  %v37_v4 = vld [vmem:[%s1009_s1 + $0x8] sm:$0xff]  ;;  %v55_v13 = vld [vmem:[%s1009_s1 + $0x98] sm:$0xff] }
   0x3   :  { %v84_v5 = vld [vmem:[%s1009_s1 + $0x180] sm:$0xff]  ;;  %v85_v6 = vld [vmem:[%s1009_s1 + $0x188] sm:$0xff]  ;;  %v134_v7 = vpack.c.bf16 %v37_v4, %v36_v2  ;;  %v38_v14 = vld [vmem:[%s1009_s1 + $0x10] sm:$0xff]  ;;  %v143_v16 = vpack.c.bf16 %v55_v13, %v54_v11 }
   0x4   :  { %v158_v8 = vpack.c.bf16 %v85_v6, %v84_v5  ;;  %v68_v9 = vld [vmem:[%s1009_s1 + $0x100] sm:$0xff]  ;;  %v69_v10 = vld [vmem:[%s1009_s1 + $0x108] sm:$0xff]  ;;  %527 = vmatprep.subr.bf16.mxu0 %v142_v3  ;;  %v39_v15 = vld [vmem:[%s1009_s1 + $0x18] sm:$0xff] }
   0x5   :  { %v150_v12 = vpack.c.bf16 %v69_v10, %v68_v9  ;;  %528 = vmatpush3.bf16.msra.mxu0 %v134_v7  ;;  %v135_v17 = vpack.c.bf16 %v39_v15, %v38_v14  ;;  %v86_v18 = vld [vmem:[%s1009_s1 + $0x190] sm:$0xff]  ;;  %v87_v19 = vld [vmem:[%s1009_s1 + $0x198] sm:$0xff]  ;;  %v56_v23 = vld [vmem:[%s1009_s1 + $0xa0] sm:$0xff] }
   0x6   :  { %549 = vmatprep.subr.bf16.mxu1 %v158_v8  ;;  %v70_v20 = vld [vmem:[%s1009_s1 + $0x110] sm:$0xff]  ;;  %v159_v21 = vpack.c.bf16 %v87_v19, %v86_v18  ;;  %v71_v22 = vld [vmem:[%s1009_s1 + $0x118] sm:$0xff]  ;;  %v57_v24 = vld [vmem:[%s1009_s1 + $0xa8] sm:$0xff]  ;;  %529 = vmatprep.subr.bf16.mxu0 %v143_v16 }
   0x7   :  { %550 = vmatpush3.bf16.msra.mxu1 %v150_v12  ;;  %v151_v25 = vpack.c.bf16 %v71_v22, %v70_v20  ;;  %v144_v26 = vpack.c.bf16 %v57_v24, %v56_v23  ;;  %v40_v27 = vld [vmem:[%s1009_s1 + $0x20] sm:$0xff]  ;;  %v41_v28 = vld [vmem:[%s1009_s1 + $0x28] sm:$0xff]  ;;  %v58_v35 = vld [vmem:[%s1009_s1 + $0xb0] sm:$0xff] }
   0x8   :  { %v88_v29 = vld [vmem:[%s1009_s1 + $0x1a0] sm:$0xff]  ;;  %551 = vmatprep.subr.bf16.mxu1 %v159_v21  ;;  %v89_v30 = vld [vmem:[%s1009_s1 + $0x1a8] sm:$0xff]  ;;  %v136_v33 = vpack.c.bf16 %v41_v28, %v40_v27  ;;  %v59_v36 = vld [vmem:[%s1009_s1 + $0xb8] sm:$0xff] }
   0x9   :  { %v72_v31 = vld [vmem:[%s1009_s1 + $0x120] sm:$0xff]  ;;  %v73_v32 = vld [vmem:[%s1009_s1 + $0x128] sm:$0xff]  ;;  %530 = vmatpush3.bf16.msra.mxu0 %v135_v17  ;;  %v160_v34 = vpack.c.bf16 %v89_v30, %v88_v29  ;;  %v42_v37 = vld [vmem:[%s1009_s1 + $0x30] sm:$0xff]  ;;  %v145_v39 = vpack.c.bf16 %v59_v36, %v58_v35 }
   0xa   :  { %531 = vmatprep.subr.bf16.mxu0 %v144_v26  ;;  %v152_v38 = vpack.c.bf16 %v73_v32, %v72_v31  ;;  %v43_v40 = vld [vmem:[%s1009_s1 + $0x38] sm:$0xff]  ;;  %v90_v41 = vld [vmem:[%s1009_s1 + $0x1b0] sm:$0xff]  ;;  %v60_v46 = vld [vmem:[%s1009_s1 + $0xc0] sm:$0xff] }
   0xb   :  { %552 = vmatpush3.bf16.msra.mxu1 %v151_v25  ;;  %v91_v42 = vld [vmem:[%s1009_s1 + $0x1b8] sm:$0xff]  ;;  %v74_v44 = vld [vmem:[%s1009_s1 + $0x130] sm:$0xff]  ;;  %v61_v47 = vld [vmem:[%s1009_s1 + $0xc8] sm:$0xff]  ;;  %v137_v48 = vpack.c.bf16 %v43_v40, %v42_v37 }
   0xc   :  { %553 = vmatprep.subr.bf16.mxu1 %v160_v34  ;;  %v161_v43 = vpack.c.bf16 %v91_v42, %v90_v41  ;;  %v75_v45 = vld [vmem:[%s1009_s1 + $0x138] sm:$0xff]  ;;  %v92_v49 = vld [vmem:[%s1009_s1 + $0x1c0] sm:$0xff]  ;;  %v93_v50 = vld [vmem:[%s1009_s1 + $0x1c8] sm:$0xff]  ;;  %v146_v52 = vpack.c.bf16 %v61_v47, %v60_v46 }
   0xd   :  { %532 = vmatpush3.bf16.msra.mxu0 %v136_v33  ;;  %v153_v51 = vpack.c.bf16 %v75_v45, %v74_v44  ;;  %v44_v53 = vld [vmem:[%s1009_s1 + $0x40] sm:$0xff]  ;;  %v45_v54 = vld [vmem:[%s1009_s1 + $0x48] sm:$0xff]  ;;  %v162_v56 = vpack.c.bf16 %v93_v50, %v92_v49  ;;  %v62_v58 = vld [vmem:[%s1009_s1 + $0xd0] sm:$0xff] }
   0xe   :  { %533 = vmatprep.subr.bf16.mxu0 %v145_v39  ;;  %v76_v55 = vld [vmem:[%s1009_s1 + $0x140] sm:$0xff]  ;;  %v77_v57 = vld [vmem:[%s1009_s1 + $0x148] sm:$0xff]  ;;  %v63_v59 = vld [vmem:[%s1009_s1 + $0xd8] sm:$0xff]  ;;  %v138_v62 = vpack.c.bf16 %v45_v54, %v44_v53 }
   0xf   :  { %554 = vmatpush3.bf16.msra.mxu1 %v152_v38  ;;  %v94_v60 = vld [vmem:[%s1009_s1 + $0x1d0] sm:$0xff]  ;;  %v95_v61 = vld [vmem:[%s1009_s1 + $0x1d8] sm:$0xff]  ;;  %v154_v63 = vpack.c.bf16 %v77_v57, %v76_v55  ;;  %v147_v0 = vpack.c.bf16 %v63_v59, %v62_v58  ;;  %v64_v6 = vld [vmem:[%s1009_s1 + $0xe0] sm:$0xff]  ;;  %v632_v55 = vmov 0.0  }
  0x10   :  { %555 = vmatprep.subr.bf16.mxu1 %v161_v43  ;;  %v46_v1 = vld [vmem:[%s1009_s1 + $0x50] sm:$0xff]  ;;  %v47_v2 = vld [vmem:[%s1009_s1 + $0x58] sm:$0xff]  ;;  %v163_v4 = vpack.c.bf16 %v95_v61, %v94_v60  ;;  %v65_v7 = vld [vmem:[%s1009_s1 + $0xe8] sm:$0xff] }
  0x11   :  { %534 = vmatpush3.bf16.msra.mxu0 %v137_v48  ;;  %v78_v3 = vld [vmem:[%s1009_s1 + $0x150] sm:$0xff]  ;;  %v79_v5 = vld [vmem:[%s1009_s1 + $0x158] sm:$0xff]  ;;  %v96_v8 = vld [vmem:[%s1009_s1 + $0x1e0] sm:$0xff]  ;;  %v139_v10 = vpack.c.bf16 %v47_v2, %v46_v1  ;;  %v148_v14 = vpack.c.bf16 %v65_v7, %v64_v6 }
  0x12   :  { %535 = vmatprep.subr.bf16.mxu0 %v146_v52  ;;  %v97_v9 = vld [vmem:[%s1009_s1 + $0x1e8] sm:$0xff]  ;;  %v48_v11 = vld [vmem:[%s1009_s1 + $0x60] sm:$0xff]  ;;  %v155_v13 = vpack.c.bf16 %v79_v5, %v78_v3  ;;  %v66_v20 = vld [vmem:[%s1009_s1 + $0xf0] sm:$0xff] }
  0x13   :  { %556 = vmatpush3.bf16.msra.mxu1 %v153_v51  ;;  %v23_v12 = vld [vmem:[%s1008_s0 + $0x8] sm:$0xff]  ;;  %v80_v16 = vld [vmem:[%s1009_s1 + $0x160] sm:$0xff]  ;;  %v164_v19 = vpack.c.bf16 %v97_v9, %v96_v8  ;;  %v67_v21 = vld [vmem:[%s1009_s1 + $0xf8] sm:$0xff] }
  0x14   :  { %557 = vmatprep.subr.bf16.mxu1 %v162_v56  ;;  %v49_v15 = vld [vmem:[%s1009_s1 + $0x68] sm:$0xff]  ;;  %v30_v18 = vpack.c.bf16 %v23_v12, %v23_v12  ;;  %v25_v22 = vld [vmem:[%s1008_s0 + $0x18] sm:$0xff]  ;;  %v98_v23 = vld [vmem:[%s1009_s1 + $0x1f0] sm:$0xff]  ;;  %v149_v28 = vpack.c.bf16 %v67_v21, %v66_v20 }
  0x15   :  { %536 = vmatpush3.bf16.msra.mxu0 %v138_v62  ;;  %v81_v17 = vld [vmem:[%s1009_s1 + $0x168] sm:$0xff]  ;;  %v99_v24 = vld [vmem:[%s1009_s1 + $0x1f8] sm:$0xff]  ;;  %v32_v25 = vpack.c.bf16 %v25_v22, %v25_v22  ;;  %v140_v26 = vpack.c.bf16 %v49_v15, %v48_v11  ;;  %v50_v29 = vld [vmem:[%s1009_s1 + $0x70] sm:$0xff] }
  0x16   :  { %537 = vmatprep.subr.bf16.mxu0 %v147_v0  ;;  %226 = vmatprep.mubr.bf16.mxu0 %v30_v18  ;;  %v156_v27 = vpack.c.bf16 %v81_v17, %v80_v16  ;;  %v51_v30 = vld [vmem:[%s1009_s1 + $0x78] sm:$0xff]  ;;  %v82_v31 = vld [vmem:[%s1009_s1 + $0x170] sm:$0xff]  ;;  %v165_v32 = vpack.c.bf16 %v99_v24, %v98_v23  ;;  %v116_v34 = vld [vmem:[%s1009_s1 + $0x280] sm:$0xff] }
  0x17   :  { %558 = vmatpush3.bf16.msra.mxu1 %v154_v63  ;;  %v83_v33 = vld [vmem:[%s1009_s1 + $0x178] sm:$0xff]  ;;  %v117_v35 = vld [vmem:[%s1009_s1 + $0x288] sm:$0xff]  ;;  %266 = vmatprep.mubr.bf16.mxu1 %v32_v25  ;;  %v141_v36 = vpack.c.bf16 %v51_v30, %v50_v29  ;;  %v22_v37 = vld [vmem:[%s1008_s0] sm:$0xff] }
  0x18   :  { %559 = vmatprep.subr.bf16.mxu1 %v163_v4  ;;  %v157_v38 = vpack.c.bf16 %v83_v33, %v82_v31  ;;  %v174_v39 = vpack.c.bf16 %v117_v35, %v116_v34  ;;  %v100_v40 = vld [vmem:[%s1009_s1 + $0x200] sm:$0xff]  ;;  %v101_v41 = vld [vmem:[%s1009_s1 + $0x208] sm:$0xff]  ;;  %v24_v42 = vld [vmem:[%s1008_s0 + $0x10] sm:$0xff]  ;;  %v29_v45 = vpack.c.bf16 %v22_v37, %v22_v37 }
  0x19   :  { %538 = vmatpush3.bf16.msra.mxu0 %v139_v10  ;;  %v118_v43 = vld [vmem:[%s1009_s1 + $0x290] sm:$0xff]  ;;  %v119_v44 = vld [vmem:[%s1009_s1 + $0x298] sm:$0xff]  ;;  %v166_v46 = vpack.c.bf16 %v101_v41, %v100_v40  ;;  %v31_v47 = vpack.c.bf16 %v24_v42, %v24_v42  ;;  %v132_v51 = vld [vmem:[%s1009_s1 + $0x300] sm:$0xff] }
  0x1a   :  { %539 = vmatprep.subr.bf16.mxu0 %v148_v14  ;;  %v102_v48 = vld [vmem:[%s1009_s1 + $0x210] sm:$0xff]  ;;  %v175_v49 = vpack.c.bf16 %v119_v44, %v118_v43  ;;  %v103_v50 = vld [vmem:[%s1009_s1 + $0x218] sm:$0xff]  ;;  %v133_v52 = vld [vmem:[%s1009_s1 + $0x308] sm:$0xff] }
  0x1b   :  { %560 = vmatpush3.bf16.msra.mxu1 %v155_v13  ;;  %v120_v53 = vld [vmem:[%s1009_s1 + $0x2a0] sm:$0xff]  ;;  %v121_v54 = vld [vmem:[%s1009_s1 + $0x2a8] sm:$0xff]  ;;  %v182_v56 = vpack.c.bf16 %v133_v52, %v132_v51 }
  0x1c   :  { %561 = vmatprep.subr.bf16.mxu1 %v164_v19  ;;  %v27_v57 = vld [vmem:[%s1008_s0 + $0x28] sm:$0xff] }
  0x1d   :  { %540 = vmatpush3.bf16.msra.mxu0 %v140_v26  ;;  %v34_v58 = vpack.c.bf16 %v27_v57, %v27_v57 }
  0x1e   :  { %541 = vmatprep.subr.bf16.mxu0 %v149_v28 }
  0x1f   :  { %562 = vmatpush3.bf16.msra.mxu1 %v156_v27 }
  0x20   :  { %563 = vmatprep.subr.bf16.mxu1 %v165_v32 }
  0x21   :  { %542 = vmatpush3.bf16.msra.mxu0 %v141_v36 }
  0x22   :  { %571 = vmatprep.subr.bf16.mxu0 %v174_v39 }
  0x23   :  { %564 = vmatpush3.bf16.msra.mxu1 %v157_v38 }
  0x24   :  { %595 = vmatprep.subr.bf16.mxu1 %v632_v55  ;;  %227 = vmatmul.mubr.bf16.vlgmr.msra.gmra.mrb[0].mxu0 %v29_v45 }
  0x25   :  { %10 = vsyncpa [#allocation3], 0  ;;  %572 = vmatpush3.bf16.msra.mxu0 %v166_v46  ;;  %v167_v59 = vpack.c.bf16 %v103_v50, %v102_v48  ;;  %v176_v60 = vpack.c.bf16 %v121_v54, %v120_v53  ;;  %v104_v61 = vld [vmem:[%s1009_s1 + $0x220] sm:$0xff]  ;;  %v105_v62 = vld [vmem:[%s1009_s1 + $0x228] sm:$0xff]  ;;  %306 = vmatprep.mubr.bf16.mxu0 %v34_v58  ;;  %vm633_vm0 = vmmov 0   ;;  %vm190_vm1 = vcmask 130048  }
  0x26   :  { %267 = vmatmul.mubr.bf16.vlgmr.msra.gmra.mrb[0].mxu1 %v31_v47  ;;  %573 = vmatprep.subr.bf16.mxu0 %v175_v49  ;;  %v28_v63 = vld [vmem:[%s1008_s0 + $0x30] sm:$0xff]  ;;  %v123_v1 = vld [vmem:[%s1009_s1 + $0x2b8] sm:$0xff]  ;;  %v168_v2 = vpack.c.bf16 %v105_v62, %v104_v61  ;;  %v124_v7 = vld [vmem:[%s1009_s1 + $0x2c0] sm:$0xff]  ;;  %v634_v34 = vmov 0  }
  0x27   :  { %596 = vmatpush3.bf16.msra.mxu1 %v182_v56  ;;  %v122_v0 = vld [vmem:[%s1009_s1 + $0x2b0] sm:$0xff]  ;;  %597 = vmatprep.mubr.msk.bf16.mxu1 %vm633_vm0, %v632_v55  ;;  %v35_v3 = vpack.c.bf16 %v28_v63, %v28_v63  ;;  %v107_v6 = vld [vmem:[%s1009_s1 + $0x238] sm:$0xff]  ;;  %v125_v8 = vld [vmem:[%s1009_s1 + $0x2c8] sm:$0xff] }
  0x28   :  { %v177_v4 = vpack.c.bf16 %v123_v1, %v122_v0  ;;  %v106_v5 = vld [vmem:[%s1009_s1 + $0x230] sm:$0xff]  ;;  %v178_v10 = vpack.c.bf16 %v125_v8, %v124_v7  ;;  %v108_v11 = vld [vmem:[%s1009_s1 + $0x240] sm:$0xff]  ;;  %v109_v12 = vld [vmem:[%s1009_s1 + $0x248] sm:$0xff]  ;;  %606 = vset.pattern.permute.xlu0 %v634_v34 }
  0x29   :  { %574 = vmatpush3.bf16.msra.mxu0 %v167_v59  ;;  %v169_v9 = vpack.c.bf16 %v107_v6, %v106_v5  ;;  %v126_v13 = vld [vmem:[%s1009_s1 + $0x2d0] sm:$0xff]  ;;  %v127_v14 = vld [vmem:[%s1009_s1 + $0x2d8] sm:$0xff]  ;;  %v170_v15 = vpack.c.bf16 %v109_v12, %v108_v11  ;;  %v128_v19 = vld [vmem:[%s1009_s1 + $0x2e0] sm:$0xff]  ;;  %v635_v59 = vmov 1  }
  0x2a   :  { %575 = vmatprep.subr.bf16.mxu0 %v176_v60  ;;  %v179_v16 = vpack.c.bf16 %v127_v14, %v126_v13  ;;  %v110_v17 = vld [vmem:[%s1009_s1 + $0x250] sm:$0xff]  ;;  %v111_v18 = vld [vmem:[%s1009_s1 + $0x258] sm:$0xff]  ;;  %v129_v20 = vld [vmem:[%s1009_s1 + $0x2e8] sm:$0xff]  ;;  %v361_v60 = vlaneseq }
  0x2b   :  { %v171_v21 = vpack.c.bf16 %v111_v18, %v110_v17  ;;  %v180_v22 = vpack.c.bf16 %v129_v20, %v128_v19  ;;  %v112_v23 = vld [vmem:[%s1009_s1 + $0x260] sm:$0xff]  ;;  %v113_v24 = vld [vmem:[%s1009_s1 + $0x268] sm:$0xff]  ;;  %v130_v25 = vld [vmem:[%s1009_s1 + $0x2f0] sm:$0xff] }
  0x2c   :  { %v131_v26 = vld [vmem:[%s1009_s1 + $0x2f8] sm:$0xff]  ;;  %v172_v27 = vpack.c.bf16 %v113_v24, %v112_v23  ;;  %v114_v29 = vld [vmem:[%s1009_s1 + $0x270] sm:$0xff]  ;;  %v26_v32 = vld [vmem:[%s1008_s0 + $0x20] sm:$0xff]  ;;  %v362_v61 = vshrl.u32 %v361_v60, 7 }
  0x2d   :  { %576 = vmatpush3.bf16.msra.mxu0 %v168_v2  ;;  %v181_v28 = vpack.c.bf16 %v131_v26, %v130_v25  ;;  %v115_v30 = vld [vmem:[%s1009_s1 + $0x278] sm:$0xff]  ;;  %v33_v33 = vpack.c.bf16 %v26_v32, %v26_v32  ;;  %v524_v36 = vld [vmem:[%s1010_s2] ss:$0 sm:$0xff]  ;;  %v526_v6 = vld [vmem:[%s1011_s3 + $0x1] ss:$2 sm:$0x7f] }
  0x2e   :  { %598 = vmatmul.mubr.msk.bf16.vlgmr.msra.gmra.mrb[4].mxu1 %vm190_vm1, %v35_v3  ;;  %577 = vmatprep.subr.bf16.mxu0 %v177_v4  ;;  %v173_v31 = vpack.c.bf16 %v115_v30, %v114_v29  ;;  %v354_v62 = vld [vmem:[%s1011_s3] ss:$2 sm:$0x7f]  ;;  %v363_v63 = vsub.s32 0, %v362_v61  ;;  %v367_v0 = vsub.s32 1, %v362_v61  ;;  %v371_v1 = vsub.s32 2, %v362_v61 }
  0x2f   :  { %v375_v2 = vsub.s32 3, %v362_v61  ;;  %v379_v3 = vsub.s32 4, %v362_v61  ;;  %v383_v4 = vsub.s32 5, %v362_v61  ;;  %v387_v5 = vsub.s32 6, %v362_v61  ;;  %s636_s3 = smov [#allocation2]  }
  0x30   :  { %v364_v7 = vrot.slane %v354_v62, %v363_v63  ;;  %v368_v8 = vrot.slane %v354_v62, %v367_v0  ;;  %v417_v17 = vrot.slane %v526_v6, %v367_v0  ;;  %v421_v18 = vrot.slane %v526_v6, %v371_v1 }
  0x31   :  { %578 = vmatpush3.bf16.msra.mxu0 %v169_v9  ;;  %v372_v9 = vrot.slane %v354_v62, %v371_v1  ;;  %v376_v11 = vrot.slane %v354_v62, %v375_v2  ;;  %v380_v12 = vrot.slane %v354_v62, %v379_v3  ;;  %v384_v13 = vrot.slane %v354_v62, %v383_v4 }
  0x32   :  { %579 = vmatprep.subr.bf16.mxu0 %v178_v10  ;;  %v459_v10 = vld [vmem:[%s1012_s4] sm:$0x7f]  ;;  %v388_v14 = vrot.slane %v354_v62, %v387_v5  ;;  %v425_v19 = vrot.slane %v526_v6, %v375_v2  ;;  %v429_v20 = vrot.slane %v526_v6, %v379_v3  ;;  %s516_s4 = sshll.u32 %s636_s3, 4  ;;  %s517_s4 = int_to_ptr.vmem [resolvable:$true] %s516_s4 }
  0x33   :  { %v464_v23 = vrot.slane %v459_v10, %v363_v63  ;;  %v468_v24 = vrot.slane %v459_v10, %v367_v0  ;;  %v472_v25 = vrot.slane %v459_v10, %v371_v1  ;;  %v476_v26 = vrot.slane %v459_v10, %v375_v2  ;;  %s608_s8 = scalar_lea.vmem %s517_s4, 896  ;;  %p613_p1 = scmp.lt.s32.totalorder %s517_s4, %s517_s4 }
  0x34   :  { %v484_v30 = vrot.slane %v459_v10, %v383_v4  ;;  %p609_p0 = scmp.ne.s32.totalorder %s517_s4, %s608_s8  ;;  %p614_p2 = scmp.lt.s32.totalorder %s608_s8, %s608_s8 }
  0x35   :  { %580 = vmatpush3.bf16.msra.mxu0 %v170_v15 }
  0x36   :  { %581 = vmatprep.subr.bf16.mxu0 %v179_v16  ;;  %v413_v16 = vrot.slane %v526_v6, %v363_v63  ;;  %p615_p3 = por %p614_p2, %p613_p1 }
  0x38   :  { %p616_p4 = pnand %p615_p3, %p609_p0 }
  0x39   :  { %582 = vmatpush3.bf16.msra.mxu0 %v171_v21  ;;  %v433_v21 = vrot.slane %v526_v6, %v383_v4 }
  0x3a   :  { %583 = vmatprep.subr.bf16.mxu0 %v180_v22  ;;  %v437_v22 = vrot.slane %v526_v6, %v387_v5 }
  0x3d   :  { %584 = vmatpush3.bf16.msra.mxu0 %v172_v27  ;;  %v480_v27 = vrot.slane %v459_v10, %v379_v3 }
  0x3e   :  { %585 = vmatprep.subr.bf16.mxu0 %v181_v28 }
  0x41   :  { %586 = vmatpush3.bf16.msra.mxu0 %v173_v31  ;;  %v488_v31 = vrot.slane %v459_v10, %v387_v5 }
  0x44   :  { %307 = vmatmul.mubr.bf16.vlgmr.msra.gmra.mrb[4].mxu0 %v33_v33 }
  0xf7   :  { %v543_v35 = vpop.f32.mrb[0].mxu0 }
  0xf8   :  { %v544_v37 = vpop.f32.mrb[1].mxu0 }
  0xf9   :  { %v565_v38 = vpop.f32.mrb[0].mxu1  ;;  %v545_v39 = vadd.f32 %v544_v37, %v543_v35  ;;  %v546_v40 = vpop.f32.mrb[2].mxu0 }
  0xfa   :  { %v566_v41 = vpop.f32.mrb[1].mxu1  ;;  %v547_v42 = vpop.f32.mrb[3].mxu0 }
  0xfb   :  { %v567_v43 = vadd.f32 %v566_v41, %v565_v38  ;;  %v568_v44 = vpop.f32.mrb[2].mxu1  ;;  %v229_v45 = vadd.f32 %v545_v39, %v524_v36 }
  0xfc   :  { %v569_v46 = vpop.f32.mrb[3].mxu1 }
  0xfd   :  { %v269_v47 = vadd.f32 %v567_v43, %v229_v45 }
 0x101   :  { %v348_v48 = vpop.f32.mrb[4].mxu1 }
 0x102   :  { %v599_v49 = vpop.f32.mrb[5].mxu1 }
 0x103   :  { %v351_v50 = vpop.f32.mrb[6].mxu1 }
 0x104   :  { %v600_v51 = vpop.f32.mrb[7].mxu1 }
 0x117   :  { %v587_v52 = vpop.f32.mrb[4].mxu0 }
 0x118   :  { %v588_v53 = vpop.f32.mrb[5].mxu0 }
 0x119   :  { %v589_v54 = vadd.f32 %v588_v53, %v587_v52  ;;  %v590_v55 = vpop.f32.mrb[6].mxu0 }
 0x11a   :  { %v591_v56 = vpop.f32.mrb[7].mxu0 }
 0x11b   :  { %v309_v57 = vadd.f32 %v589_v54, %v269_v47 }
 0x11d   :  { %v349_v58 = vadd.f32 %v348_v48, %v309_v57 }
 0x11f   :  { %357 = vperm.xlu0 %606, %v349_v58  }
 0x123   :  { %607 = vset.pattern.permute.xlu0 %v635_v59 }
 0x124   :  { %406 = vperm.xlu0 %607, %v349_v58  }
 0x19e   :  { %v358_v15 = vpop.permute.xlu0 %357 }
 0x19f   :  { %v396_v28 = vmul.f32 %v364_v7, %v358_v15  ;;  %v397_v29 = vmul.f32 %v368_v8, %v358_v15  ;;  %v398_v32 = vmul.f32 %v372_v9, %v358_v15  ;;  %v399_v33 = vmul.f32 %v376_v11, %v358_v15 }
 0x1a0   :  { %v400_v34 = vmul.f32 %v380_v12, %v358_v15  ;;  %v401_v35 = vmul.f32 %v384_v13, %v358_v15  ;;  %v402_v41 = vmul.f32 %v388_v14, %v358_v15 }
 0x1a3   :  { %v407_v36 = vpop.permute.xlu0 %406 }
 0x1a4   :  { %v445_v37 = vmul.f32 %v413_v16, %v407_v36  ;;  %v446_v38 = vmul.f32 %v417_v17, %v407_v36  ;;  %v447_v39 = vmul.f32 %v421_v18, %v407_v36  ;;  %v448_v40 = vmul.f32 %v425_v19, %v407_v36 }
 0x1a5   :  { %v449_v42 = vmul.f32 %v429_v20, %v407_v36  ;;  %v450_v43 = vmul.f32 %v433_v21, %v407_v36  ;;  %v451_v44 = vmul.f32 %v437_v22, %v407_v36 }
 0x1a6   :  { %v452_v45 = vadd.f32 %v445_v37, %v396_v28  ;;  %v453_v46 = vadd.f32 %v446_v38, %v397_v29  ;;  %v454_v47 = vadd.f32 %v447_v39, %v398_v32  ;;  %v455_v48 = vadd.f32 %v448_v40, %v399_v33 }
 0x1a7   :  { %v456_v49 = vadd.f32 %v449_v42, %v400_v34  ;;  %v457_v50 = vadd.f32 %v450_v43, %v401_v35  ;;  %v458_v51 = vadd.f32 %v451_v44, %v402_v41 }
 0x1a8   :  { %v496_v52 = vadd.f32 %v464_v23, %v452_v45  ;;  %v497_v53 = vadd.f32 %v468_v24, %v453_v46  ;;  %v498_v54 = vadd.f32 %v472_v25, %v454_v47  ;;  %v499_v55 = vadd.f32 %v476_v26, %v455_v48 }
 0x1a9   :  { %v500_v56 = vadd.f32 %v480_v27, %v456_v49  ;;  %v501_v57 = vadd.f32 %v484_v30, %v457_v50  ;;  %v502_v58 = vadd.f32 %v488_v31, %v458_v51 }
 0x1aa   :  { %503 = vst [vmem:[#allocation2] sm:$0xff] %v496_v52  ;;  %504 = vst [vmem:[#allocation2 + $0x8] sm:$0xff] %v497_v53 }
 0x1ab   :  { %505 = vst [vmem:[#allocation2 + $0x10] sm:$0xff] %v498_v54  ;;  %506 = vst [vmem:[#allocation2 + $0x18] sm:$0xff] %v499_v55 }
 0x1ac   :  { %507 = vst [vmem:[#allocation2 + $0x20] sm:$0xff] %v500_v56  ;;  %508 = vst [vmem:[#allocation2 + $0x28] sm:$0xff] %v501_v57 }
 0x1ad   :  { %509 = vst.msk [vmem:[#allocation2 + $0x30] sm:$0xff] %vm190_vm1, %v502_v58 }
 0x1ae   :  { %619 = shalt.err (!%p616_p4)
}
 0x1af   :  { %s620_s11 = scalar_lea.hbm %s1013_s5, 896 }
 0x1b0   :  { %p621_p5 = scmp.ne.s32.totalorder %s1013_s5, %s620_s11  ;;  %p624_p6 = scmp.lt.u32.totalorder %s620_s11, %s1013_s5 }
 0x1b2   :  { %p626_p7 = pnand %p624_p6, %p621_p5 }
 0x1b4   :  { %629 = shalt.err (!%p626_p7)
}
 0x1b5   :  { %519 = dma.vmem_to_hbm [thread:$0]  %s517_s4, 896, %s1013_s5, [#allocation3]  }
 0x1b6   :  { %630 = dma.done.wait [#allocation3], 896  }
 0x1b7   :  { %631 = vsyncadd [#allocation3], 4294966400 }
 0x1b8   :  { %523 = vsyncpa [#allocation3], 1 }

</bundles_post_ra>
